<compile_context>
chip_gen: v5e
topology: v5e:2x2
jax: 0.10.0
libtpu: 0.0.40
codegen_flags: <defaults>
</compile_context>

<pallas_src>
import jax
import jax.numpy as jnp
from jax.experimental import pallas as pl
from jax.experimental.pallas import tpu as pltpu

T = 28   # sequence length (must equal 28 so Linear(28, 10) applies)
D = 28   # input_size
H = 1    # hidden_size
C = 10   # num classes

_SUB = 8            # sublanes per vreg (batch fold factor)
_L_TILE_MAX = 512   # lanes per packed tile -> up to 4096 batch elements per tile


def _cdiv(a: int, b: int) -> int:
    return -(-a // b)


def _round_up(n: int, m: int) -> int:
    return ((n + m - 1) // m) * m


def _choose_tiles(B: int):
    """Pick (l_tile, l_pad, num_tiles) for the packed-batch layout.

    Packed batch = 8 (sublanes) * l_pad (lanes); l_tile is a multiple of 128.
    Balances tiles to bound padding waste and keeps >=2 tiles for large B so both
    v7x TensorCores get work.
    """
    l_min = _cdiv(max(B, 1), _SUB)
    l128 = _round_up(l_min, 128)
    num_tiles = _cdiv(l128, _L_TILE_MAX)
    if B >= 2048:
        num_tiles = max(num_tiles, 2)      # v7x: keep both TCs busy
    l_tile = _round_up(_cdiv(l128, num_tiles), 128)
    l_pad = num_tiles * l_tile
    return l_tile, l_pad, num_tiles


def rnn_kernel(s_ref, w_hh_ref, w_exp_ref, o_ref, h_ref):
    """Sublane-packed tanh recurrence over T steps + one MXU classifier matmul.

    s_ref:     (T, 8, L_TILE)   VMEM  packed pre-activations x_t.w_ih + b_ih + b_hh
                                      (batch folded as b = sublane*L_pad + lane)
    w_hh_ref:  (1, 1)           SMEM  hidden-to-hidden scalar weight
    w_exp_ref: (8*C, 8*T)       VMEM  block-expanded classifier weight
    o_ref:     (8*C, L_TILE)    VMEM  packed logits (lane-dense output)
    h_ref:     (8*T, L_TILE)    VMEM  scratch: hidden state for step t at rows t*8..t*8+8
    """
    t_steps = s_ref.shape[0]
    l_tile = s_ref.shape[2]

    # Hoisted scalar -> vreg broadcast (JAX does not CSE broadcast_in_dim).
    w_hh_v = jnp.full((_SUB, l_tile), w_hh_ref[0, 0], jnp.float32)

    # Step 0: h_{-1} = 0  =>  h_0 = tanh(S_0).  Each step is full (8,128)-dense
    # VPU + EUP work; the store is one aligned, unmasked (8, L_TILE) slab.
    h = jnp.tanh(s_ref[0])
    h_ref[pl.ds(0, _SUB), :] = h
    for t in range(1, t_steps):
        h = jnp.tanh(s_ref[t] + w_hh_v * h)
        h_ref[pl.ds(t * _SUB, _SUB), :] = h

    # Single MXU matmul replaces any per-step rank-1 updates / relayouts:
    #   (8C, 8T) @ (8T, L_TILE) -> (8C, L_TILE), lane-dense store.
    o_ref[...] = jnp.dot(w_exp_ref[...], h_ref[...],
                         preferred_element_type=jnp.float32)


@jax.jit
def rnn_forward(x, w_ih, w_hh, b_ih, b_hh, w_out, b_out):
    """x: (B, T, D) batch-first, like PyTorch. Returns (B, 10) logits."""
    B = x.shape[0]
    assert x.shape[1] == T and x.shape[2] == D

    x = x.astype(jnp.float32)
    w_ih_vec = w_ih.reshape(D).astype(jnp.float32)            # hidden_size == 1
    bias = (b_ih.reshape(-1)[0] + b_hh.reshape(-1)[0]).astype(jnp.float32)

    # Hoisted input projection for ALL timesteps: one XLA contraction, x read once,
    # result already time-major with batch on the minor axis.
    s_tb = jnp.einsum("btd,d->tb", x, w_ih_vec) + bias        # (T, B)

    # Packed batch tiling: batch folded over (sublane=8, lane=L_pad); b = s*L_pad + l.
    l_tile, l_pad, num_tiles = _choose_tiles(B)
    b_pack = _SUB * l_pad
    if b_pack != B:
        # Padded columns are exactly 0 -> their hidden state stays tanh(0) = 0 and the
        # corresponding logits are sliced off below.
        s_tb = jnp.pad(s_tb, ((0, 0), (0, b_pack - B)))
    s_packed = s_tb.reshape(T, _SUB, l_pad)                   # (T, 8, L_pad)

    w_hh_s = w_hh.reshape(1, 1).astype(jnp.float32)           # (1, 1) scalar -> SMEM

    # Block-expanded classifier weight so the contraction runs directly on the packed
    # hidden-state layout:  W_exp[s*C + c, t*8 + s'] = w_out[c, t] * (s == s').
    eye8 = jnp.eye(_SUB, dtype=jnp.float32)
    w_exp = (eye8[:, None, None, :]
             * w_out.astype(jnp.float32)[None, :, :, None]    # (8, C, T, 8)
             ).reshape(_SUB * C, T * _SUB)                    # (80, 224)

    grid = (num_tiles,)
    out_packed = pl.pallas_call(
        rnn_kernel,
        out_shape=jax.ShapeDtypeStruct((_SUB * C, l_pad), jnp.float32),
        grid=grid,
        in_specs=[
            pl.BlockSpec((T, _SUB, l_tile), lambda i: (0, 0, i)),   # packed S tile
            pl.BlockSpec(memory_space=pltpu.MemorySpace.SMEM),      # w_hh scalar
            pl.BlockSpec((_SUB * C, _SUB * T), lambda i: (0, 0)),   # expanded classifier
        ],
        out_specs=pl.BlockSpec((_SUB * C, l_tile), lambda i: (0, i)),  # lane-dense
        scratch_shapes=[pltpu.VMEM((_SUB * T, l_tile), jnp.float32)],
        compiler_params=pltpu.CompilerParams(
            dimension_semantics=("parallel",),     # megacore-shard batch tiles on v7x
        ),
    )(s_packed, w_hh_s, w_exp)

    # Unpack (8*C, L_pad): row r = s*C + c, col l, batch b = s*L_pad + l.
    out = (out_packed.reshape(_SUB, C, l_pad)
           .transpose(0, 2, 1)
           .reshape(b_pack, C))[:B]
    return out + b_out.astype(jnp.float32)[None, :]           # bias added in wrapper


def rnn_forward_ref(x, w_ih, w_hh, b_ih, b_hh, w_out, b_out):
    """Pure-JAX reference of the PyTorch forward for verification."""
    B = x.shape[0]
    h = jnp.zeros((B, H), jnp.float32)
    hs = []
    for t in range(T):
        h = jnp.tanh(x[:, t, :] @ w_ih.T + b_ih + h @ w_hh.T + b_hh)
        hs.append(h[:, 0])
    outreshape = jnp.stack(hs, axis=1)          # (B, T)
    return outreshape @ w_out.T + b_out         # (B, C)


if __name__ == "__main__":
    key = jax.random.PRNGKey(0)
    k_x, k1, k2, k3, k4, k5, k6 = jax.random.split(key, 7)

    B = 2
    x = jax.random.normal(k_x, (B, T, D), dtype=jnp.float32)

    # Deterministic parameter init (PyTorch-style uniform bounds).
    bound_rnn = 1.0 / jnp.sqrt(jnp.float32(H))   # 1/sqrt(hidden_size) = 1.0
    bound_fc = 1.0 / jnp.sqrt(jnp.float32(T))    # 1/sqrt(in_features=28)
    w_ih = jax.random.uniform(k1, (H, D), jnp.float32, -bound_rnn, bound_rnn)
    w_hh = jax.random.uniform(k2, (H, H), jnp.float32, -bound_rnn, bound_rnn)
    b_ih = jax.random.uniform(k3, (H,), jnp.float32, -bound_rnn, bound_rnn)
    b_hh = jax.random.uniform(k4, (H,), jnp.float32, -bound_rnn, bound_rnn)
    w_out = jax.random.uniform(k5, (C, T), jnp.float32, -bound_fc, bound_fc)
    b_out = jax.random.uniform(k6, (C,), jnp.float32, -bound_fc, bound_fc)

    out = rnn_forward(x, w_ih, w_hh, b_ih, b_hh, w_out, b_out)
    out = jax.block_until_ready(out)

    ref = rnn_forward_ref(x, w_ih, w_hh, b_ih, b_hh, w_out, b_out)
    if not jnp.allclose(out, ref, atol=1e-4, rtol=1e-4):
        raise AssertionError(f"Pallas kernel mismatch vs reference:\n{out}\n{ref}")

    print("KERNEL_OK")
</pallas_src>

<mosaic_0001>
module attributes {stable_mosaic.version = 11 : i64} {
  func.func @rnn_kernel(%arg0: i32, %arg1: memref<28x8x128xf32, #tpu.memory_space<vmem>>, %arg2: memref<1x1xf32, #tpu.memory_space<smem>>, %arg3: memref<80x224xf32, #tpu.memory_space<vmem>>, %arg4: memref<80x128xf32, #tpu.memory_space<vmem>>, %arg5: memref<224x128xf32, #tpu.memory_space<vmem>>) attributes {dimension_semantics = [#tpu.dimension_semantics<parallel>], iteration_bounds = array<i64: 1>, scalar_prefetch = 0 : i64, scratch_operands = 1 : i64, tpu.core_type = #tpu.core_type<tc>, window_params = [{transform_indices = @transform_0, window_bounds = array<i64: 28, 8, 128>}, {transform_indices = @transform_1, window_bounds = array<i64: 1, 1>}, {pipeline_mode = #tpu.pipeline_mode<synchronous>, transform_indices = @transform_2, window_bounds = array<i64: 80, 224>}, {transform_indices = @transform_3, window_bounds = array<i64: 80, 128>}]} {
    %c0 = arith.constant 0 : index
    %c0_0 = arith.constant 0 : index
    %0 = memref.load %arg2[%c0, %c0_0] : memref<1x1xf32, #tpu.memory_space<smem>>
    %1 = vector.broadcast %0 : f32 to vector<8x128xf32>
    %c0_1 = arith.constant 0 : index
    %c0_2 = arith.constant 0 : index
    %c0_3 = arith.constant 0 : index
    %2 = vector.load %arg1[%c0_1, %c0_2, %c0_3] : memref<28x8x128xf32, #tpu.memory_space<vmem>>, vector<1x8x128xf32>
    %3 = vector.shape_cast %2 : vector<1x8x128xf32> to vector<8x128xf32>
    %4 = math.tanh %3 : vector<8x128xf32>
    %c0_4 = arith.constant 0 : index
    %c0_5 = arith.constant 0 : index
    %5 = vector.load %arg5[%c0_4, %c0_5] : memref<224x128xf32, #tpu.memory_space<vmem>>, vector<8x128xf32>
    tpu.vector_store %arg5[%c0_4, %c0_5], %4 {strides = array<i32>} : memref<224x128xf32, #tpu.memory_space<vmem>>, vector<8x128xf32>,
    %c1 = arith.constant 1 : index
    %c0_6 = arith.constant 0 : index
    %c0_7 = arith.constant 0 : index
    %6 = vector.load %arg1[%c1, %c0_6, %c0_7] : memref<28x8x128xf32, #tpu.memory_space<vmem>>, vector<1x8x128xf32>
    %7 = vector.shape_cast %6 : vector<1x8x128xf32> to vector<8x128xf32>
    %8 = arith.mulf %1, %4 : vector<8x128xf32>
    %9 = arith.addf %7, %8 : vector<8x128xf32>
    %10 = math.tanh %9 : vector<8x128xf32>
    %c8 = arith.constant 8 : index
    %c0_8 = arith.constant 0 : index
    %11 = vector.load %arg5[%c8, %c0_8] : memref<224x128xf32, #tpu.memory_space<vmem>>, vector<8x128xf32>
    tpu.vector_store %arg5[%c8, %c0_8], %10 {strides = array<i32>} : memref<224x128xf32, #tpu.memory_space<vmem>>, vector<8x128xf32>,
    %c2 = arith.constant 2 : index
    %c0_9 = arith.constant 0 : index
    %c0_10 = arith.constant 0 : index
    %12 = vector.load %arg1[%c2, %c0_9, %c0_10] : memref<28x8x128xf32, #tpu.memory_space<vmem>>, vector<1x8x128xf32>
    %13 = vector.shape_cast %12 : vector<1x8x128xf32> to vector<8x128xf32>
    %14 = arith.mulf %1, %10 : vector<8x128xf32>
    %15 = arith.addf %13, %14 : vector<8x128xf32>
    %16 = math.tanh %15 : vector<8x128xf32>
    %c16 = arith.constant 16 : index
    %c0_11 = arith.constant 0 : index
    %17 = vector.load %arg5[%c16, %c0_11] : memref<224x128xf32, #tpu.memory_space<vmem>>, vector<8x128xf32>
    tpu.vector_store %arg5[%c16, %c0_11], %16 {strides = array<i32>} : memref<224x128xf32, #tpu.memory_space<vmem>>, vector<8x128xf32>,
    %c3 = arith.constant 3 : index
    %c0_12 = arith.constant 0 : index
    %c0_13 = arith.constant 0 : index
    %18 = vector.load %arg1[%c3, %c0_12, %c0_13] : memref<28x8x128xf32, #tpu.memory_space<vmem>>, vector<1x8x128xf32>
    %19 = vector.shape_cast %18 : vector<1x8x128xf32> to vector<8x128xf32>
    %20 = arith.mulf %1, %16 : vector<8x128xf32>
    %21 = arith.addf %19, %20 : vector<8x128xf32>
    %22 = math.tanh %21 : vector<8x128xf32>
    %c24 = arith.constant 24 : index
    %c0_14 = arith.constant 0 : index
    %23 = vector.load %arg5[%c24, %c0_14] : memref<224x128xf32, #tpu.memory_space<vmem>>, vector<8x128xf32>
    tpu.vector_store %arg5[%c24, %c0_14], %22 {strides = array<i32>} : memref<224x128xf32, #tpu.memory_space<vmem>>, vector<8x128xf32>,
    %c4 = arith.constant 4 : index
    %c0_15 = arith.constant 0 : index
    %c0_16 = arith.constant 0 : index
    %24 = vector.load %arg1[%c4, %c0_15, %c0_16] : memref<28x8x128xf32, #tpu.memory_space<vmem>>, vector<1x8x128xf32>
    %25 = vector.shape_cast %24 : vector<1x8x128xf32> to vector<8x128xf32>
    %26 = arith.mulf %1, %22 : vector<8x128xf32>
    %27 = arith.addf %25, %26 : vector<8x128xf32>
    %28 = math.tanh %27 : vector<8x128xf32>
    %c32 = arith.constant 32 : index
    %c0_17 = arith.constant 0 : index
    %29 = vector.load %arg5[%c32, %c0_17] : memref<224x128xf32, #tpu.memory_space<vmem>>, vector<8x128xf32>
    tpu.vector_store %arg5[%c32, %c0_17], %28 {strides = array<i32>} : memref<224x128xf32, #tpu.memory_space<vmem>>, vector<8x128xf32>,
    %c5 = arith.constant 5 : index
    %c0_18 = arith.constant 0 : index
    %c0_19 = arith.constant 0 : index
    %30 = vector.load %arg1[%c5, %c0_18, %c0_19] : memref<28x8x128xf32, #tpu.memory_space<vmem>>, vector<1x8x128xf32>
    %31 = vector.shape_cast %30 : vector<1x8x128xf32> to vector<8x128xf32>
    %32 = arith.mulf %1, %28 : vector<8x128xf32>
    %33 = arith.addf %31, %32 : vector<8x128xf32>
    %34 = math.tanh %33 : vector<8x128xf32>
    %c40 = arith.constant 40 : index
    %c0_20 = arith.constant 0 : index
    %35 = vector.load %arg5[%c40, %c0_20] : memref<224x128xf32, #tpu.memory_space<vmem>>, vector<8x128xf32>
    tpu.vector_store %arg5[%c40, %c0_20], %34 {strides = array<i32>} : memref<224x128xf32, #tpu.memory_space<vmem>>, vector<8x128xf32>,
    %c6 = arith.constant 6 : index
    %c0_21 = arith.constant 0 : index
    %c0_22 = arith.constant 0 : index
    %36 = vector.load %arg1[%c6, %c0_21, %c0_22] : memref<28x8x128xf32, #tpu.memory_space<vmem>>, vector<1x8x128xf32>
    %37 = vector.shape_cast %36 : vector<1x8x128xf32> to vector<8x128xf32>
    %38 = arith.mulf %1, %34 : vector<8x128xf32>
    %39 = arith.addf %37, %38 : vector<8x128xf32>
    %40 = math.tanh %39 : vector<8x128xf32>
    %c48 = arith.constant 48 : index
    %c0_23 = arith.constant 0 : index
    %41 = vector.load %arg5[%c48, %c0_23] : memref<224x128xf32, #tpu.memory_space<vmem>>, vector<8x128xf32>
    tpu.vector_store %arg5[%c48, %c0_23], %40 {strides = array<i32>} : memref<224x128xf32, #tpu.memory_space<vmem>>, vector<8x128xf32>,
    %c7 = arith.constant 7 : index
    %c0_24 = arith.constant 0 : index
    %c0_25 = arith.constant 0 : index
    %42 = vector.load %arg1[%c7, %c0_24, %c0_25] : memref<28x8x128xf32, #tpu.memory_space<vmem>>, vector<1x8x128xf32>
    %43 = vector.shape_cast %42 : vector<1x8x128xf32> to vector<8x128xf32>
    %44 = arith.mulf %1, %40 : vector<8x128xf32>
    %45 = arith.addf %43, %44 : vector<8x128xf32>
    %46 = math.tanh %45 : vector<8x128xf32>
    %c56 = arith.constant 56 : index
    %c0_26 = arith.constant 0 : index
    %47 = vector.load %arg5[%c56, %c0_26] : memref<224x128xf32, #tpu.memory_space<vmem>>, vector<8x128xf32>
    tpu.vector_store %arg5[%c56, %c0_26], %46 {strides = array<i32>} : memref<224x128xf32, #tpu.memory_space<vmem>>, vector<8x128xf32>,
    %c8_27 = arith.constant 8 : index
    %c0_28 = arith.constant 0 : index
    %c0_29 = arith.constant 0 : index
    %48 = vector.load %arg1[%c8_27, %c0_28, %c0_29] : memref<28x8x128xf32, #tpu.memory_space<vmem>>, vector<1x8x128xf32>
    %49 = vector.shape_cast %48 : vector<1x8x128xf32> to vector<8x128xf32>
    %50 = arith.mulf %1, %46 : vector<8x128xf32>
    %51 = arith.addf %49, %50 : vector<8x128xf32>
    %52 = math.tanh %51 : vector<8x128xf32>
    %c64 = arith.constant 64 : index
    %c0_30 = arith.constant 0 : index
    %53 = vector.load %arg5[%c64, %c0_30] : memref<224x128xf32, #tpu.memory_space<vmem>>, vector<8x128xf32>
    tpu.vector_store %arg5[%c64, %c0_30], %52 {strides = array<i32>} : memref<224x128xf32, #tpu.memory_space<vmem>>, vector<8x128xf32>,
    %c9 = arith.constant 9 : index
    %c0_31 = arith.constant 0 : index
    %c0_32 = arith.constant 0 : index
    %54 = vector.load %arg1[%c9, %c0_31, %c0_32] : memref<28x8x128xf32, #tpu.memory_space<vmem>>, vector<1x8x128xf32>
    %55 = vector.shape_cast %54 : vector<1x8x128xf32> to vector<8x128xf32>
    %56 = arith.mulf %1, %52 : vector<8x128xf32>
    %57 = arith.addf %55, %56 : vector<8x128xf32>
    %58 = math.tanh %57 : vector<8x128xf32>
    %c72 = arith.constant 72 : index
    %c0_33 = arith.constant 0 : index
    %59 = vector.load %arg5[%c72, %c0_33] : memref<224x128xf32, #tpu.memory_space<vmem>>, vector<8x128xf32>
    tpu.vector_store %arg5[%c72, %c0_33], %58 {strides = array<i32>} : memref<224x128xf32, #tpu.memory_space<vmem>>, vector<8x128xf32>,
    %c10 = arith.constant 10 : index
    %c0_34 = arith.constant 0 : index
    %c0_35 = arith.constant 0 : index
    %60 = vector.load %arg1[%c10, %c0_34, %c0_35] : memref<28x8x128xf32, #tpu.memory_space<vmem>>, vector<1x8x128xf32>
    %61 = vector.shape_cast %60 : vector<1x8x128xf32> to vector<8x128xf32>
    %62 = arith.mulf %1, %58 : vector<8x128xf32>
    %63 = arith.addf %61, %62 : vector<8x128xf32>
    %64 = math.tanh %63 : vector<8x128xf32>
    %c80 = arith.constant 80 : index
    %c0_36 = arith.constant 0 : index
    %65 = vector.load %arg5[%c80, %c0_36] : memref<224x128xf32, #tpu.memory_space<vmem>>, vector<8x128xf32>
    tpu.vector_store %arg5[%c80, %c0_36], %64 {strides = array<i32>} : memref<224x128xf32, #tpu.memory_space<vmem>>, vector<8x128xf32>,
    %c11 = arith.constant 11 : index
    %c0_37 = arith.constant 0 : index
    %c0_38 = arith.constant 0 : index
    %66 = vector.load %arg1[%c11, %c0_37, %c0_38] : memref<28x8x128xf32, #tpu.memory_space<vmem>>, vector<1x8x128xf32>
    %67 = vector.shape_cast %66 : vector<1x8x128xf32> to vector<8x128xf32>
    %68 = arith.mulf %1, %64 : vector<8x128xf32>
    %69 = arith.addf %67, %68 : vector<8x128xf32>
    %70 = math.tanh %69 : vector<8x128xf32>
    %c88 = arith.constant 88 : index
    %c0_39 = arith.constant 0 : index
    %71 = vector.load %arg5[%c88, %c0_39] : memref<224x128xf32, #tpu.memory_space<vmem>>, vector<8x128xf32>
    tpu.vector_store %arg5[%c88, %c0_39], %70 {strides = array<i32>} : memref<224x128xf32, #tpu.memory_space<vmem>>, vector<8x128xf32>,
    %c12 = arith.constant 12 : index
    %c0_40 = arith.constant 0 : index
    %c0_41 = arith.constant 0 : index
    %72 = vector.load %arg1[%c12, %c0_40, %c0_41] : memref<28x8x128xf32, #tpu.memory_space<vmem>>, vector<1x8x128xf32>
    %73 = vector.shape_cast %72 : vector<1x8x128xf32> to vector<8x128xf32>
    %74 = arith.mulf %1, %70 : vector<8x128xf32>
    %75 = arith.addf %73, %74 : vector<8x128xf32>
    %76 = math.tanh %75 : vector<8x128xf32>
    %c96 = arith.constant 96 : index
    %c0_42 = arith.constant 0 : index
    %77 = vector.load %arg5[%c96, %c0_42] : memref<224x128xf32, #tpu.memory_space<vmem>>, vector<8x128xf32>
    tpu.vector_store %arg5[%c96, %c0_42], %76 {strides = array<i32>} : memref<224x128xf32, #tpu.memory_space<vmem>>, vector<8x128xf32>,
    %c13 = arith.constant 13 : index
    %c0_43 = arith.constant 0 : index
    %c0_44 = arith.constant 0 : index
    %78 = vector.load %arg1[%c13, %c0_43, %c0_44] : memref<28x8x128xf32, #tpu.memory_space<vmem>>, vector<1x8x128xf32>
    %79 = vector.shape_cast %78 : vector<1x8x128xf32> to vector<8x128xf32>
    %80 = arith.mulf %1, %76 : vector<8x128xf32>
    %81 = arith.addf %79, %80 : vector<8x128xf32>
    %82 = math.tanh %81 : vector<8x128xf32>
    %c104 = arith.constant 104 : index
    %c0_45 = arith.constant 0 : index
    %83 = vector.load %arg5[%c104, %c0_45] : memref<224x128xf32, #tpu.memory_space<vmem>>, vector<8x128xf32>
    tpu.vector_store %arg5[%c104, %c0_45], %82 {strides = array<i32>} : memref<224x128xf32, #tpu.memory_space<vmem>>, vector<8x128xf32>,
    %c14 = arith.constant 14 : index
    %c0_46 = arith.constant 0 : index
    %c0_47 = arith.constant 0 : index
    %84 = vector.load %arg1[%c14, %c0_46, %c0_47] : memref<28x8x128xf32, #tpu.memory_space<vmem>>, vector<1x8x128xf32>
    %85 = vector.shape_cast %84 : vector<1x8x128xf32> to vector<8x128xf32>
    %86 = arith.mulf %1, %82 : vector<8x128xf32>
    %87 = arith.addf %85, %86 : vector<8x128xf32>
    %88 = math.tanh %87 : vector<8x128xf32>
    %c112 = arith.constant 112 : index
    %c0_48 = arith.constant 0 : index
    %89 = vector.load %arg5[%c112, %c0_48] : memref<224x128xf32, #tpu.memory_space<vmem>>, vector<8x128xf32>
    tpu.vector_store %arg5[%c112, %c0_48], %88 {strides = array<i32>} : memref<224x128xf32, #tpu.memory_space<vmem>>, vector<8x128xf32>,
    %c15 = arith.constant 15 : index
    %c0_49 = arith.constant 0 : index
    %c0_50 = arith.constant 0 : index
    %90 = vector.load %arg1[%c15, %c0_49, %c0_50] : memref<28x8x128xf32, #tpu.memory_space<vmem>>, vector<1x8x128xf32>
    %91 = vector.shape_cast %90 : vector<1x8x128xf32> to vector<8x128xf32>
    %92 = arith.mulf %1, %88 : vector<8x128xf32>
    %93 = arith.addf %91, %92 : vector<8x128xf32>
    %94 = math.tanh %93 : vector<8x128xf32>
    %c120 = arith.constant 120 : index
    %c0_51 = arith.constant 0 : index
    %95 = vector.load %arg5[%c120, %c0_51] : memref<224x128xf32, #tpu.memory_space<vmem>>, vector<8x128xf32>
    tpu.vector_store %arg5[%c120, %c0_51], %94 {strides = array<i32>} : memref<224x128xf32, #tpu.memory_space<vmem>>, vector<8x128xf32>,
    %c16_52 = arith.constant 16 : index
    %c0_53 = arith.constant 0 : index
    %c0_54 = arith.constant 0 : index
    %96 = vector.load %arg1[%c16_52, %c0_53, %c0_54] : memref<28x8x128xf32, #tpu.memory_space<vmem>>, vector<1x8x128xf32>
    %97 = vector.shape_cast %96 : vector<1x8x128xf32> to vector<8x128xf32>
    %98 = arith.mulf %1, %94 : vector<8x128xf32>
    %99 = arith.addf %97, %98 : vector<8x128xf32>
    %100 = math.tanh %99 : vector<8x128xf32>
    %c128 = arith.constant 128 : index
    %c0_55 = arith.constant 0 : index
    %101 = vector.load %arg5[%c128, %c0_55] : memref<224x128xf32, #tpu.memory_space<vmem>>, vector<8x128xf32>
    tpu.vector_store %arg5[%c128, %c0_55], %100 {strides = array<i32>} : memref<224x128xf32, #tpu.memory_space<vmem>>, vector<8x128xf32>,
    %c17 = arith.constant 17 : index
    %c0_56 = arith.constant 0 : index
    %c0_57 = arith.constant 0 : index
    %102 = vector.load %arg1[%c17, %c0_56, %c0_57] : memref<28x8x128xf32, #tpu.memory_space<vmem>>, vector<1x8x128xf32>
    %103 = vector.shape_cast %102 : vector<1x8x128xf32> to vector<8x128xf32>
    %104 = arith.mulf %1, %100 : vector<8x128xf32>
    %105 = arith.addf %103, %104 : vector<8x128xf32>
    %106 = math.tanh %105 : vector<8x128xf32>
    %c136 = arith.constant 136 : index
    %c0_58 = arith.constant 0 : index
    %107 = vector.load %arg5[%c136, %c0_58] : memref<224x128xf32, #tpu.memory_space<vmem>>, vector<8x128xf32>
    tpu.vector_store %arg5[%c136, %c0_58], %106 {strides = array<i32>} : memref<224x128xf32, #tpu.memory_space<vmem>>, vector<8x128xf32>,
    %c18 = arith.constant 18 : index
    %c0_59 = arith.constant 0 : index
    %c0_60 = arith.constant 0 : index
    %108 = vector.load %arg1[%c18, %c0_59, %c0_60] : memref<28x8x128xf32, #tpu.memory_space<vmem>>, vector<1x8x128xf32>
    %109 = vector.shape_cast %108 : vector<1x8x128xf32> to vector<8x128xf32>
    %110 = arith.mulf %1, %106 : vector<8x128xf32>
    %111 = arith.addf %109, %110 : vector<8x128xf32>
    %112 = math.tanh %111 : vector<8x128xf32>
    %c144 = arith.constant 144 : index
    %c0_61 = arith.constant 0 : index
    %113 = vector.load %arg5[%c144, %c0_61] : memref<224x128xf32, #tpu.memory_space<vmem>>, vector<8x128xf32>
    tpu.vector_store %arg5[%c144, %c0_61], %112 {strides = array<i32>} : memref<224x128xf32, #tpu.memory_space<vmem>>, vector<8x128xf32>,
    %c19 = arith.constant 19 : index
    %c0_62 = arith.constant 0 : index
    %c0_63 = arith.constant 0 : index
    %114 = vector.load %arg1[%c19, %c0_62, %c0_63] : memref<28x8x128xf32, #tpu.memory_space<vmem>>, vector<1x8x128xf32>
    %115 = vector.shape_cast %114 : vector<1x8x128xf32> to vector<8x128xf32>
    %116 = arith.mulf %1, %112 : vector<8x128xf32>
    %117 = arith.addf %115, %116 : vector<8x128xf32>
    %118 = math.tanh %117 : vector<8x128xf32>
    %c152 = arith.constant 152 : index
    %c0_64 = arith.constant 0 : index
    %119 = vector.load %arg5[%c152, %c0_64] : memref<224x128xf32, #tpu.memory_space<vmem>>, vector<8x128xf32>
    tpu.vector_store %arg5[%c152, %c0_64], %118 {strides = array<i32>} : memref<224x128xf32, #tpu.memory_space<vmem>>, vector<8x128xf32>,
    %c20 = arith.constant 20 : index
    %c0_65 = arith.constant 0 : index
    %c0_66 = arith.constant 0 : index
    %120 = vector.load %arg1[%c20, %c0_65, %c0_66] : memref<28x8x128xf32, #tpu.memory_space<vmem>>, vector<1x8x128xf32>
    %121 = vector.shape_cast %120 : vector<1x8x128xf32> to vector<8x128xf32>
    %122 = arith.mulf %1, %118 : vector<8x128xf32>
    %123 = arith.addf %121, %122 : vector<8x128xf32>
    %124 = math.tanh %123 : vector<8x128xf32>
    %c160 = arith.constant 160 : index
    %c0_67 = arith.constant 0 : index
    %125 = vector.load %arg5[%c160, %c0_67] : memref<224x128xf32, #tpu.memory_space<vmem>>, vector<8x128xf32>
    tpu.vector_store %arg5[%c160, %c0_67], %124 {strides = array<i32>} : memref<224x128xf32, #tpu.memory_space<vmem>>, vector<8x128xf32>,
    %c21 = arith.constant 21 : index
    %c0_68 = arith.constant 0 : index
    %c0_69 = arith.constant 0 : index
    %126 = vector.load %arg1[%c21, %c0_68, %c0_69] : memref<28x8x128xf32, #tpu.memory_space<vmem>>, vector<1x8x128xf32>
    %127 = vector.shape_cast %126 : vector<1x8x128xf32> to vector<8x128xf32>
    %128 = arith.mulf %1, %124 : vector<8x128xf32>
    %129 = arith.addf %127, %128 : vector<8x128xf32>
    %130 = math.tanh %129 : vector<8x128xf32>
    %c168 = arith.constant 168 : index
    %c0_70 = arith.constant 0 : index
    %131 = vector.load %arg5[%c168, %c0_70] : memref<224x128xf32, #tpu.memory_space<vmem>>, vector<8x128xf32>
    tpu.vector_store %arg5[%c168, %c0_70], %130 {strides = array<i32>} : memref<224x128xf32, #tpu.memory_space<vmem>>, vector<8x128xf32>,
    %c22 = arith.constant 22 : index
    %c0_71 = arith.constant 0 : index
    %c0_72 = arith.constant 0 : index
    %132 = vector.load %arg1[%c22, %c0_71, %c0_72] : memref<28x8x128xf32, #tpu.memory_space<vmem>>, vector<1x8x128xf32>
    %133 = vector.shape_cast %132 : vector<1x8x128xf32> to vector<8x128xf32>
    %134 = arith.mulf %1, %130 : vector<8x128xf32>
    %135 = arith.addf %133, %134 : vector<8x128xf32>
    %136 = math.tanh %135 : vector<8x128xf32>
    %c176 = arith.constant 176 : index
    %c0_73 = arith.constant 0 : index
    %137 = vector.load %arg5[%c176, %c0_73] : memref<224x128xf32, #tpu.memory_space<vmem>>, vector<8x128xf32>
    tpu.vector_store %arg5[%c176, %c0_73], %136 {strides = array<i32>} : memref<224x128xf32, #tpu.memory_space<vmem>>, vector<8x128xf32>,
    %c23 = arith.constant 23 : index
    %c0_74 = arith.constant 0 : index
    %c0_75 = arith.constant 0 : index
    %138 = vector.load %arg1[%c23, %c0_74, %c0_75] : memref<28x8x128xf32, #tpu.memory_space<vmem>>, vector<1x8x128xf32>
    %139 = vector.shape_cast %138 : vector<1x8x128xf32> to vector<8x128xf32>
    %140 = arith.mulf %1, %136 : vector<8x128xf32>
    %141 = arith.addf %139, %140 : vector<8x128xf32>
    %142 = math.tanh %141 : vector<8x128xf32>
    %c184 = arith.constant 184 : index
    %c0_76 = arith.constant 0 : index
    %143 = vector.load %arg5[%c184, %c0_76] : memref<224x128xf32, #tpu.memory_space<vmem>>, vector<8x128xf32>
    tpu.vector_store %arg5[%c184, %c0_76], %142 {strides = array<i32>} : memref<224x128xf32, #tpu.memory_space<vmem>>, vector<8x128xf32>,
    %c24_77 = arith.constant 24 : index
    %c0_78 = arith.constant 0 : index
    %c0_79 = arith.constant 0 : index
    %144 = vector.load %arg1[%c24_77, %c0_78, %c0_79] : memref<28x8x128xf32, #tpu.memory_space<vmem>>, vector<1x8x128xf32>
    %145 = vector.shape_cast %144 : vector<1x8x128xf32> to vector<8x128xf32>
    %146 = arith.mulf %1, %142 : vector<8x128xf32>
    %147 = arith.addf %145, %146 : vector<8x128xf32>
    %148 = math.tanh %147 : vector<8x128xf32>
    %c192 = arith.constant 192 : index
    %c0_80 = arith.constant 0 : index
    %149 = vector.load %arg5[%c192, %c0_80] : memref<224x128xf32, #tpu.memory_space<vmem>>, vector<8x128xf32>
    tpu.vector_store %arg5[%c192, %c0_80], %148 {strides = array<i32>} : memref<224x128xf32, #tpu.memory_space<vmem>>, vector<8x128xf32>,
    %c25 = arith.constant 25 : index
    %c0_81 = arith.constant 0 : index
    %c0_82 = arith.constant 0 : index
    %150 = vector.load %arg1[%c25, %c0_81, %c0_82] : memref<28x8x128xf32, #tpu.memory_space<vmem>>, vector<1x8x128xf32>
    %151 = vector.shape_cast %150 : vector<1x8x128xf32> to vector<8x128xf32>
    %152 = arith.mulf %1, %148 : vector<8x128xf32>
    %153 = arith.addf %151, %152 : vector<8x128xf32>
    %154 = math.tanh %153 : vector<8x128xf32>
    %c200 = arith.constant 200 : index
    %c0_83 = arith.constant 0 : index
    %155 = vector.load %arg5[%c200, %c0_83] : memref<224x128xf32, #tpu.memory_space<vmem>>, vector<8x128xf32>
    tpu.vector_store %arg5[%c200, %c0_83], %154 {strides = array<i32>} : memref<224x128xf32, #tpu.memory_space<vmem>>, vector<8x128xf32>,
    %c26 = arith.constant 26 : index
    %c0_84 = arith.constant 0 : index
    %c0_85 = arith.constant 0 : index
    %156 = vector.load %arg1[%c26, %c0_84, %c0_85] : memref<28x8x128xf32, #tpu.memory_space<vmem>>, vector<1x8x128xf32>
    %157 = vector.shape_cast %156 : vector<1x8x128xf32> to vector<8x128xf32>
    %158 = arith.mulf %1, %154 : vector<8x128xf32>
    %159 = arith.addf %157, %158 : vector<8x128xf32>
    %160 = math.tanh %159 : vector<8x128xf32>
    %c208 = arith.constant 208 : index
    %c0_86 = arith.constant 0 : index
    %161 = vector.load %arg5[%c208, %c0_86] : memref<224x128xf32, #tpu.memory_space<vmem>>, vector<8x128xf32>
    tpu.vector_store %arg5[%c208, %c0_86], %160 {strides = array<i32>} : memref<224x128xf32, #tpu.memory_space<vmem>>, vector<8x128xf32>,
    %c27 = arith.constant 27 : index
    %c0_87 = arith.constant 0 : index
    %c0_88 = arith.constant 0 : index
    %162 = vector.load %arg1[%c27, %c0_87, %c0_88] : memref<28x8x128xf32, #tpu.memory_space<vmem>>, vector<1x8x128xf32>
    %163 = vector.shape_cast %162 : vector<1x8x128xf32> to vector<8x128xf32>
    %164 = arith.mulf %1, %160 : vector<8x128xf32>
    %165 = arith.addf %163, %164 : vector<8x128xf32>
    %166 = math.tanh %165 : vector<8x128xf32>
    %c216 = arith.constant 216 : index
    %c0_89 = arith.constant 0 : index
    %167 = vector.load %arg5[%c216, %c0_89] : memref<224x128xf32, #tpu.memory_space<vmem>>, vector<8x128xf32>
    tpu.vector_store %arg5[%c216, %c0_89], %166 {strides = array<i32>} : memref<224x128xf32, #tpu.memory_space<vmem>>, vector<8x128xf32>,
    %c0_90 = arith.constant 0 : index
    %c0_91 = arith.constant 0 : index
    %168 = vector.load %arg3[%c0_90, %c0_91] : memref<80x224xf32, #tpu.memory_space<vmem>>, vector<80x224xf32>
    %c0_92 = arith.constant 0 : index
    %c0_93 = arith.constant 0 : index
    %169 = vector.load %arg5[%c0_92, %c0_93] : memref<224x128xf32, #tpu.memory_space<vmem>>, vector<224x128xf32>
    %cst = arith.constant dense<0.000000e+00> : vector<80x128xf32>
    %170 = tpu.matmul %168, %169, %cst {dimension_numbers = #tpu.dot_dimension_numbers<[1], [0], [0], [1], [0, 0, 1, 1], [], []>} : vector<80x224xf32>, vector<224x128xf32>, vector<80x128xf32> -> vector<80x128xf32>
    %c0_94 = arith.constant 0 : index
    %c0_95 = arith.constant 0 : index
    %171 = vector.load %arg4[%c0_94, %c0_95] : memref<80x128xf32, #tpu.memory_space<vmem>>, vector<80x128xf32>
    tpu.vector_store %arg4[%c0_94, %c0_95], %170 {strides = array<i32>} : memref<80x128xf32, #tpu.memory_space<vmem>>, vector<80x128xf32>,
    return
  }
  func.func @transform_0(%arg0: i32) -> (i32, i32, i32) {
    %c0_i32 = arith.constant 0 : i32
    %c0_i32_0 = arith.constant 0 : i32
    %c0_i32_1 = arith.constant 0 : i32
    return %c0_i32, %c0_i32_0, %arg0 : i32, i32, i32
  }
  func.func @transform_1(%arg0: i32) -> (i32, i32) {
    %c0_i32 = arith.constant 0 : i32
    %c0_i32_0 = arith.constant 0 : i32
    %c0_i32_1 = arith.constant 0 : i32
    return %c0_i32, %c0_i32_0 : i32, i32
  }
  func.func @transform_2(%arg0: i32) -> (i32, i32) {
    %c0_i32 = arith.constant 0 : i32
    %c0_i32_0 = arith.constant 0 : i32
    %c0_i32_1 = arith.constant 0 : i32
    return %c0_i32, %c0_i32_0 : i32, i32
  }
  func.func @transform_3(%arg0: i32) -> (i32, i32) {
    %c0_i32 = arith.constant 0 : i32
    %c0_i32_0 = arith.constant 0 : i32
    return %c0_i32, %arg0 : i32, i32
  }
}

</mosaic_0001>

<bundles_post_ra>
// kernel: rnn_forward.1
= control target key start
LH: loop header
LB: loop body
LE: loop exit
PB: predicated region body
PF: predicated region fallthrough
CT: control target
= control target key end

     0   :  { %vm230_vm0 = vcmask 785408   ;;  %s791_s0 = inlined_call_operand.vmem [shape: f32[28,8,128], index: 0, kind: input, shape index: {}]   ;;  %s792_s1 = inlined_call_operand.<no memory space> [shape: f32[1,1], index: 1, kind: input, shape index: {}]   ;;  %s793_s2 = inlined_call_operand.vmem [shape: f32[80,224], index: 2, kind: input, shape index: {}]   ;;  %s794_s3 = inlined_call_operand.vmem [shape: f32[80,128], index: 3, kind: output, shape index: {}]  }
   0x1   :  { %v17_v0 = vld [vmem:[%s791_s0] sm:$0xff]  ;;  %v516_v1 = vstv %s792_s1  ;;  %v369_v3 = vld [vmem:[%s791_s0 + $0x8] sm:$0xff]  ;;  %v370_v7 = vld [vmem:[%s791_s0 + $0x10] sm:$0xff] }
   0x2   :  { %434 = vtanh.f32 %v17_v0  ;;  %v371_v11 = vld [vmem:[%s791_s0 + $0x18] sm:$0xff]  ;;  %v372_v15 = vld [vmem:[%s791_s0 + $0x20] sm:$0xff]  ;;  %v373_v19 = vld [vmem:[%s791_s0 + $0x28] sm:$0xff] }
   0x3   :  { %v374_v23 = vld [vmem:[%s791_s0 + $0x30] sm:$0xff]  ;;  %v375_v27 = vld [vmem:[%s791_s0 + $0x38] sm:$0xff]  ;;  %v376_v31 = vld [vmem:[%s791_s0 + $0x40] sm:$0xff] }
   0x4   :  { %v377_v35 = vld [vmem:[%s791_s0 + $0x48] sm:$0xff]  ;;  %v378_v39 = vld [vmem:[%s791_s0 + $0x50] sm:$0xff]  ;;  %v379_v43 = vld [vmem:[%s791_s0 + $0x58] sm:$0xff] }
   0x5   :  { %v380_v47 = vld [vmem:[%s791_s0 + $0x60] sm:$0xff]  ;;  %v381_v51 = vld [vmem:[%s791_s0 + $0x68] sm:$0xff]  ;;  %v382_v55 = vld [vmem:[%s791_s0 + $0x70] sm:$0xff] }
   0x6   :  { %v383_v59 = vld [vmem:[%s791_s0 + $0x78] sm:$0xff]  ;;  %v384_v63 = vld [vmem:[%s791_s0 + $0x80] sm:$0xff] }
   0x8   :  { %v518_v2 = vpop.eup %434 }
   0x9   :  { %v22_v4 = vmul.f32 %v518_v2, %v516_v1 }
   0xb   :  { %v23_v5 = vadd.f32 %v369_v3, %v22_v4 }
   0xd   :  { %436 = vtanh.f32 %v23_v5  ;;  %v385_v5 = vld [vmem:[%s791_s0 + $0x88] sm:$0xff] }
  0x13   :  { %v525_v6 = vpop.eup %436 }
  0x14   :  { %v28_v8 = vmul.f32 %v525_v6, %v516_v1 }
  0x16   :  { %v29_v9 = vadd.f32 %v370_v7, %v28_v8 }
  0x18   :  { %438 = vtanh.f32 %v29_v9 }
  0x1e   :  { %v532_v10 = vpop.eup %438 }
  0x1f   :  { %v34_v12 = vmul.f32 %v532_v10, %v516_v1 }
  0x21   :  { %v35_v13 = vadd.f32 %v371_v11, %v34_v12  ;;  %v386_v11 = vld [vmem:[%s791_s0 + $0x90] sm:$0xff] }
  0x23   :  { %440 = vtanh.f32 %v35_v13 }
  0x29   :  { %v539_v14 = vpop.eup %440 }
  0x2a   :  { %v40_v16 = vmul.f32 %v539_v14, %v516_v1 }
  0x2c   :  { %v41_v17 = vadd.f32 %v372_v15, %v40_v16  ;;  %v387_v16 = vld [vmem:[%s791_s0 + $0x98] sm:$0xff] }
  0x2e   :  { %442 = vtanh.f32 %v41_v17 }
  0x34   :  { %v546_v18 = vpop.eup %442 }
  0x35   :  { %v46_v20 = vmul.f32 %v546_v18, %v516_v1 }
  0x37   :  { %v47_v21 = vadd.f32 %v373_v19, %v46_v20  ;;  %v389_v20 = vld [vmem:[%s791_s0 + $0xa8] sm:$0xff] }
  0x39   :  { %444 = vtanh.f32 %v47_v21 }
  0x3f   :  { %v553_v22 = vpop.eup %444 }
  0x40   :  { %v52_v24 = vmul.f32 %v553_v22, %v516_v1 }
  0x42   :  { %v53_v25 = vadd.f32 %v374_v23, %v52_v24  ;;  %v390_v24 = vld [vmem:[%s791_s0 + $0xb0] sm:$0xff] }
  0x44   :  { %446 = vtanh.f32 %v53_v25 }
  0x4a   :  { %v560_v26 = vpop.eup %446 }
  0x4b   :  { %v58_v28 = vmul.f32 %v560_v26, %v516_v1 }
  0x4d   :  { %v59_v29 = vadd.f32 %v375_v27, %v58_v28  ;;  %v391_v28 = vld [vmem:[%s791_s0 + $0xb8] sm:$0xff] }
  0x4f   :  { %448 = vtanh.f32 %v59_v29 }
  0x55   :  { %v567_v30 = vpop.eup %448 }
  0x56   :  { %v64_v32 = vmul.f32 %v567_v30, %v516_v1 }
  0x58   :  { %v65_v33 = vadd.f32 %v376_v31, %v64_v32  ;;  %v392_v32 = vld [vmem:[%s791_s0 + $0xc0] sm:$0xff] }
  0x5a   :  { %450 = vtanh.f32 %v65_v33 }
  0x60   :  { %v451_v34 = vpop.eup %450 }
  0x61   :  { %v70_v36 = vmul.f32 %v451_v34, %v516_v1 }
  0x63   :  { %v71_v37 = vadd.f32 %v377_v35, %v70_v36  ;;  %v393_v36 = vld [vmem:[%s791_s0 + $0xc8] sm:$0xff] }
  0x65   :  { %452 = vtanh.f32 %v71_v37 }
  0x6b   :  { %v453_v38 = vpop.eup %452 }
  0x6c   :  { %v76_v40 = vmul.f32 %v453_v38, %v516_v1 }
  0x6e   :  { %v77_v41 = vadd.f32 %v378_v39, %v76_v40  ;;  %v394_v40 = vld [vmem:[%s791_s0 + $0xd0] sm:$0xff] }
  0x70   :  { %454 = vtanh.f32 %v77_v41 }
  0x76   :  { %v455_v42 = vpop.eup %454 }
  0x77   :  { %v82_v44 = vmul.f32 %v455_v42, %v516_v1 }
  0x79   :  { %v83_v45 = vadd.f32 %v379_v43, %v82_v44  ;;  %v190_v43 = vld [vmem:[%s793_s2 + $0x40] sm:$0xff] }
  0x7b   :  { %456 = vtanh.f32 %v83_v45  ;;  %v395_v45 = vld [vmem:[%s791_s0 + $0xd8] sm:$0xff] }
  0x81   :  { %v457_v46 = vpop.eup %456 }
  0x82   :  { %v88_v48 = vmul.f32 %v457_v46, %v516_v1 }
  0x84   :  { %v89_v49 = vadd.f32 %v380_v47, %v88_v48  ;;  %v182_v47 = vld [vmem:[%s793_s2] sm:$0xff] }
  0x86   :  { %458 = vtanh.f32 %v89_v49  ;;  %v192_v49 = vld [vmem:[%s793_s2 + $0x50] sm:$0xff] }
  0x8c   :  { %v459_v50 = vpop.eup %458 }
  0x8d   :  { %v94_v52 = vmul.f32 %v459_v50, %v516_v1 }
  0x8f   :  { %v95_v53 = vadd.f32 %v381_v51, %v94_v52  ;;  %v186_v52 = vld [vmem:[%s793_s2 + $0x20] sm:$0xff] }
  0x91   :  { %460 = vtanh.f32 %v95_v53  ;;  %v196_v53 = vld [vmem:[%s793_s2 + $0x70] sm:$0xff] }
  0x97   :  { %v461_v54 = vpop.eup %460 }
  0x98   :  { %v100_v56 = vmul.f32 %v461_v54, %v516_v1 }
  0x9a   :  { %v101_v57 = vadd.f32 %v382_v55, %v100_v56  ;;  %v198_v55 = vld [vmem:[%s793_s2 + $0x80] sm:$0xff]  ;;  %v183_v56 = vld [vmem:[%s793_s2 + $0x8] sm:$0xff] }
  0x9c   :  { %462 = vtanh.f32 %v101_v57  ;;  %v195_v57 = vld [vmem:[%s793_s2 + $0x68] sm:$0xff] }
  0xa2   :  { %v463_v58 = vpop.eup %462 }
  0xa3   :  { %v106_v60 = vmul.f32 %v463_v58, %v516_v1 }
  0xa5   :  { %v107_v61 = vadd.f32 %v383_v59, %v106_v60  ;;  %v185_v59 = vld [vmem:[%s793_s2 + $0x18] sm:$0xff] }
  0xa6   :  { %v197_v60 = vld [vmem:[%s793_s2 + $0x78] sm:$0xff] }
  0xa7   :  { %464 = vtanh.f32 %v107_v61  ;;  %v187_v61 = vld [vmem:[%s793_s2 + $0x28] sm:$0xff] }
  0xad   :  { %v465_v62 = vpop.eup %464 }
  0xae   :  { %v112_v0 = vmul.f32 %v465_v62, %v516_v1  ;;  %406 = vmatpush.msra.mxu2 %v465_v62  ;;  %261 = vmatpush.msra.mxu0 %v465_v62  ;;  %v199_v62 = vld [vmem:[%s793_s2 + $0x88] sm:$0xff] }
  0xb0   :  { %v113_v3 = vadd.f32 %v384_v63, %v112_v0  ;;  %407 = vmatpush.msra.mxu2 %v463_v58  ;;  %262 = vmatpush.msra.mxu0 %v463_v58  ;;  %v200_v58 = vld [vmem:[%s793_s2 + $0x90] sm:$0xff]  ;;  %v189_v63 = vld [vmem:[%s793_s2 + $0x38] sm:$0xff] }
  0xb1   :  { %v201_v0 = vld [vmem:[%s793_s2 + $0x98] sm:$0xff] }
  0xb2   :  { %466 = vtanh.f32 %v113_v3  ;;  %408 = vmatpush.msra.mxu2 %v461_v54  ;;  %263 = vmatpush.msra.mxu0 %v461_v54  ;;  %v188_v54 = vld [vmem:[%s793_s2 + $0x30] sm:$0xff]  ;;  %v191_v3 = vld [vmem:[%s793_s2 + $0x48] sm:$0xff] }
  0xb4   :  { %409 = vmatpush.msra.mxu2 %v459_v50  ;;  %264 = vmatpush.msra.mxu0 %v459_v50  ;;  %v184_v50 = vld [vmem:[%s793_s2 + $0x10] sm:$0xff] }
  0xb6   :  { %410 = vmatpush.msra.mxu2 %v457_v46  ;;  %265 = vmatpush.msra.mxu0 %v457_v46 }
  0xb8   :  { %v606_v4 = vpop.eup %466  ;;  %411 = vmatpush.msra.mxu2 %v455_v42  ;;  %266 = vmatpush.msra.mxu0 %v455_v42 }
  0xb9   :  { %v118_v7 = vmul.f32 %v606_v4, %v516_v1 }
  0xba   :  { %412 = vmatpush.msra.mxu2 %v453_v38  ;;  %267 = vmatpush.msra.mxu0 %v453_v38 }
  0xbb   :  { %v119_v8 = vadd.f32 %v385_v5, %v118_v7 }
  0xbc   :  { %413 = vmatpush.msra.mxu2 %v451_v34  ;;  %268 = vmatpush.msra.mxu0 %v451_v34 }
  0xbd   :  { %468 = vtanh.f32 %v119_v8 }
  0xbe   :  { %414 = vmatpush.msra.mxu2 %v567_v30  ;;  %269 = vmatpush.msra.mxu0 %v567_v30 }
  0xc0   :  { %415 = vmatpush.msra.mxu2 %v560_v26  ;;  %270 = vmatpush.msra.mxu0 %v560_v26 }
  0xc2   :  { %416 = vmatpush.msra.mxu2 %v553_v22  ;;  %271 = vmatpush.msra.mxu0 %v553_v22 }
  0xc3   :  { %v619_v9 = vpop.eup %468 }
  0xc4   :  { %v124_v12 = vmul.f32 %v619_v9, %v516_v1  ;;  %417 = vmatpush.msra.mxu2 %v546_v18  ;;  %272 = vmatpush.msra.mxu0 %v546_v18 }
  0xc6   :  { %v125_v13 = vadd.f32 %v386_v11, %v124_v12  ;;  %418 = vmatpush.msra.mxu2 %v539_v14  ;;  %273 = vmatpush.msra.mxu0 %v539_v14 }
  0xc8   :  { %470 = vtanh.f32 %v125_v13  ;;  %419 = vmatpush.msra.mxu2 %v532_v10  ;;  %274 = vmatpush.msra.mxu0 %v532_v10 }
  0xca   :  { %420 = vmatpush.msra.mxu2 %v525_v6  ;;  %275 = vmatpush.msra.mxu0 %v525_v6  ;;  %v388_v6 = vld [vmem:[%s791_s0 + $0xa0] sm:$0xff] }
  0xcc   :  { %421 = vmatpush.msra.mxu2 %v518_v2  ;;  %276 = vmatpush.msra.mxu0 %v518_v2 }
  0xcd   :  { %289 = vmatmul.f32.vlgmr.msra.gmra.mxu2 %v190_v43  ;;  %277 = vmatmul.f32.vlgmr.msra.gmra.mxu0 %v182_v47 }
  0xce   :  { %v636_v15 = vpop.eup %470 }
  0xcf   :  { %v130_v14 = vmul.f32 %v636_v15, %v516_v1 }
  0xd1   :  { %v131_v17 = vadd.f32 %v387_v16, %v130_v14 }
  0xd3   :  { %472 = vtanh.f32 %v131_v17 }
  0xd5   :  { %292 = vmatmul.f32.gmra.mxu2 %v192_v49  ;;  %280 = vmatmul.f32.gmra.mxu0 %v184_v50 }
  0xd9   :  { %v643_v10 = vpop.eup %472 }
  0xda   :  { %v136_v2 = vmul.f32 %v643_v10, %v516_v1 }
  0xdc   :  { %v137_v18 = vadd.f32 %v388_v6, %v136_v2 }
  0xdd   :  { %283 = vmatmul.f32.gmra.mxu0 %v186_v52 }
  0xde   :  { %474 = vtanh.f32 %v137_v18 }
  0xe4   :  { %v650_v19 = vpop.eup %474 }
  0xe5   :  { %v142_v21 = vmul.f32 %v650_v19, %v516_v1  ;;  %286 = vmatmul.f32.gmra.mxu0 %v188_v54 }
  0xe7   :  { %v143_v22 = vadd.f32 %v389_v20, %v142_v21 }
  0xe9   :  { %476 = vtanh.f32 %v143_v22 }
  0xef   :  { %v477_v23 = vpop.eup %476 }
  0xf0   :  { %v148_v25 = vmul.f32 %v477_v23, %v516_v1 }
  0xf2   :  { %v149_v26 = vadd.f32 %v390_v24, %v148_v25 }
  0xf4   :  { %478 = vtanh.f32 %v149_v26 }
  0xfa   :  { %v479_v27 = vpop.eup %478 }
  0xfb   :  { %v154_v29 = vmul.f32 %v479_v27, %v516_v1 }
  0xfd   :  { %v155_v30 = vadd.f32 %v391_v28, %v154_v29 }
  0xff   :  { %480 = vtanh.f32 %v155_v30 }
 0x105   :  { %v481_v31 = vpop.eup %480 }
 0x106   :  { %v160_v33 = vmul.f32 %v481_v31, %v516_v1 }
 0x108   :  { %v161_v34 = vadd.f32 %v392_v32, %v160_v33 }
 0x10a   :  { %482 = vtanh.f32 %v161_v34 }
 0x110   :  { %v483_v35 = vpop.eup %482 }
 0x111   :  { %v166_v37 = vmul.f32 %v483_v35, %v516_v1 }
 0x113   :  { %v167_v38 = vadd.f32 %v393_v36, %v166_v37 }
 0x115   :  { %484 = vtanh.f32 %v167_v38 }
 0x11b   :  { %v485_v39 = vpop.eup %484 }
 0x11c   :  { %v172_v41 = vmul.f32 %v485_v39, %v516_v1 }
 0x11e   :  { %v173_v42 = vadd.f32 %v394_v40, %v172_v41 }
 0x120   :  { %486 = vtanh.f32 %v173_v42 }
 0x126   :  { %v487_v44 = vpop.eup %486 }
 0x127   :  { %v178_v46 = vmul.f32 %v487_v44, %v516_v1  ;;  %v194_v1 = vld [vmem:[%s793_s2 + $0x60] sm:$0xff] }
 0x128   :  { %295 = vmatmul.f32.gmra.mxu2 %v194_v1 }
 0x129   :  { %v179_v48 = vadd.f32 %v395_v45, %v178_v46 }
 0x12b   :  { %488 = vtanh.f32 %v179_v48 }
 0x130   :  { %298 = vmatmul.f32.gmra.mxu2 %v196_v53 }
 0x131   :  { %v489_v51 = vpop.eup %488 }
 0x132   :  { %312 = vmatpush.msra.mxu1 %v489_v51  ;;  %422 = vmatpush.msra.mxu3 %v489_v51 }
 0x134   :  { %313 = vmatpush.msra.mxu1 %v487_v44  ;;  %423 = vmatpush.msra.mxu3 %v487_v44 }
 0x136   :  { %314 = vmatpush.msra.mxu1 %v485_v39  ;;  %424 = vmatpush.msra.mxu3 %v485_v39 }
 0x138   :  { %315 = vmatpush.msra.mxu1 %v483_v35  ;;  %425 = vmatpush.msra.mxu3 %v483_v35 }
 0x139   :  { %301 = vmatmul.f32.gmra.mxu2 %v198_v55 }
 0x13a   :  { %316 = vmatpush.msra.mxu1 %v481_v31  ;;  %426 = vmatpush.msra.mxu3 %v481_v31 }
 0x13c   :  { %317 = vmatpush.msra.mxu1 %v479_v27  ;;  %427 = vmatpush.msra.mxu3 %v479_v27 }
 0x13e   :  { %318 = vmatpush.msra.mxu1 %v477_v23  ;;  %428 = vmatpush.msra.mxu3 %v477_v23 }
 0x140   :  { %319 = vmatpush.msra.mxu1 %v650_v19  ;;  %429 = vmatpush.msra.mxu3 %v650_v19 }
 0x141   :  { %304 = vmatmul.f32.gmra.mxu2 %v200_v58 }
 0x142   :  { %320 = vmatpush.msra.mxu1 %v643_v10  ;;  %430 = vmatpush.msra.mxu3 %v643_v10 }
 0x144   :  { %321 = vmatpush.msra.mxu1 %v636_v15  ;;  %431 = vmatpush.msra.mxu3 %v636_v15 }
 0x146   :  { %322 = vmatpush.msra.mxu1 %v619_v9  ;;  %432 = vmatpush.msra.mxu3 %v619_v9 }
 0x148   :  { %323 = vmatpush.msra.mxu1 %v606_v4  ;;  %433 = vmatpush.msra.mxu3 %v606_v4  ;;  %v193_v4 = vld [vmem:[%s793_s2 + $0x58] sm:$0xff] }
 0x149   :  { %396 = vmatmul.msk.f32.vlgmr.msra.gmra.mxu1 %vm230_vm0, %v183_v56  ;;  %402 = vmatmul.msk.f32.vlgmr.msra.gmra.mxu3 %vm230_vm0, %v195_v57 }
 0x14a   :  { %v278_v8 = vpop.f32.mrf.mxu0 }
 0x150   :  { %v290_v5 = vpop.f32.mrf.mxu2 }
 0x151   :  { %397 = vmatmul.msk.f32.gmra.mxu1 %vm230_vm0, %v185_v59  ;;  %403 = vmatmul.msk.f32.gmra.mxu3 %vm230_vm0, %v197_v60 }
 0x152   :  { %v281_v13 = vpop.f32.mrf.mxu0 }
 0x158   :  { %v293_v7 = vpop.f32.mrf.mxu2 }
 0x159   :  { %398 = vmatmul.msk.f32.gmra.mxu1 %vm230_vm0, %v187_v61  ;;  %404 = vmatmul.msk.f32.gmra.mxu3 %vm230_vm0, %v199_v62 }
 0x15a   :  { %v284_v6 = vpop.f32.mrf.mxu0 }
 0x161   :  { %399 = vmatmul.msk.f32.gmra.mxu1 %vm230_vm0, %v189_v63  ;;  %405 = vmatmul.msk.f32.gmra.mxu3 %vm230_vm0, %v201_v0 }
 0x162   :  { %v287_v22 = vpop.f32.mrf.mxu0 }
 0x169   :  { %400 = vmatmul.msk.f32.gmra.mxu1 %vm230_vm0, %v191_v3 }
 0x171   :  { %401 = vmatmul.msk.f32.gmra.mxu1 %vm230_vm0, %v193_v4 }
 0x1ab   :  { %v296_v9 = vpop.f32.mrf.mxu2 }
 0x1b3   :  { %v299_v17 = vpop.f32.mrf.mxu2 }
 0x1bc   :  { %v302_v21 = vpop.f32.mrf.mxu2 }
 0x1c4   :  { %v305_v27 = vpop.f32.mrf.mxu2 }
 0x1c6   :  { %v325_v11 = vpop.f32.mrf.mxu1 }
 0x1c7   :  { %v326_v12 = vadd.f32 %v325_v11, %v278_v8 }
 0x1c9   :  { %355 = vst [vmem:[%s794_s3] sm:$0xff] %v326_v12 }
 0x1cc   :  { %v343_v15 = vpop.f32.mrf.mxu3 }
 0x1cd   :  { %v344_v16 = vadd.f32 %v343_v15, %v296_v9 }
 0x1ce   :  { %v328_v14 = vpop.f32.mrf.mxu1 }
 0x1cf   :  { %v329_v10 = vadd.f32 %v328_v14, %v281_v13  ;;  %361 = vst [vmem:[%s794_s3 + $0x30] sm:$0xff] %v344_v16 }
 0x1d1   :  { %356 = vst [vmem:[%s794_s3 + $0x8] sm:$0xff] %v329_v10 }
 0x1d4   :  { %v346_v2 = vpop.f32.mrf.mxu3 }
 0x1d5   :  { %v347_v18 = vadd.f32 %v346_v2, %v299_v17 }
 0x1d6   :  { %v331_v19 = vpop.f32.mrf.mxu1 }
 0x1d7   :  { %v332_v20 = vadd.f32 %v331_v19, %v284_v6  ;;  %362 = vst [vmem:[%s794_s3 + $0x38] sm:$0xff] %v347_v18 }
 0x1d9   :  { %357 = vst [vmem:[%s794_s3 + $0x10] sm:$0xff] %v332_v20 }
 0x1dc   :  { %v349_v23 = vpop.f32.mrf.mxu3 }
 0x1dd   :  { %v350_v24 = vadd.f32 %v349_v23, %v302_v21 }
 0x1de   :  { %v334_v25 = vpop.f32.mrf.mxu1 }
 0x1df   :  { %v335_v26 = vadd.f32 %v334_v25, %v287_v22  ;;  %363 = vst [vmem:[%s794_s3 + $0x40] sm:$0xff] %v350_v24 }
 0x1e1   :  { %358 = vst [vmem:[%s794_s3 + $0x18] sm:$0xff] %v335_v26 }
 0x1e4   :  { %v352_v28 = vpop.f32.mrf.mxu3 }
 0x1e5   :  { %v353_v29 = vadd.f32 %v352_v28, %v305_v27 }
 0x1e6   :  { %v337_v30 = vpop.f32.mrf.mxu1 }
 0x1e7   :  { %v338_v31 = vadd.f32 %v337_v30, %v290_v5  ;;  %364 = vst [vmem:[%s794_s3 + $0x48] sm:$0xff] %v353_v29 }
 0x1e9   :  { %359 = vst [vmem:[%s794_s3 + $0x20] sm:$0xff] %v338_v31 }
 0x1ee   :  { %v340_v32 = vpop.f32.mrf.mxu1 }
 0x1ef   :  { %v341_v33 = vadd.f32 %v340_v32, %v293_v7 }
 0x1f1   :  { %360 = vst [vmem:[%s794_s3 + $0x28] sm:$0xff] %v341_v33 }

</bundles_post_ra>
